<compile_context>
chip_gen: v5e
topology: v5e:2x2
jax: 0.10.0
libtpu: 0.0.40
codegen_flags: <defaults>
</compile_context>

<pallas_src>
import functools

import jax
import jax.numpy as jnp
from jax import lax
from jax.experimental import pallas as pl
from jax.experimental.pallas import tpu as pltpu


def _round_up(x, m):
    return (x + m - 1) // m * m


def _vmem_capacity_bytes():
    try:
        return int(pltpu.get_tpu_info().vmem_capacity_bytes)
    except Exception:
        return 64 * 1024 * 1024


_VMEM_CAP_BYTES = _vmem_capacity_bytes()


def _whisper_attn_kernel(x_ref, wq_ref, bq_ref, wkv_ref, bkv_ref, wo_ref, bo_ref,
                         o_ref, kv_ref, *, num_heads, head_dim, q_tile,
                         seq_len, seq_pad):
    """One grid step = (batch element b, query tile qi).

    x_ref   : (T_pad, E)   bf16  padded hidden states of batch b (leading dim squeezed)
    wq_ref  : (E, E)       bf16  Wq^T * scaling, columns head-major
    bq_ref  : (1, E)       f32   bq * scaling
    wkv_ref : (E, 2E)      bf16  [Wk^T | Wv^T], columns head-major within each half
    bkv_ref : (1, 2E)      f32   [0 (k has no bias) | bv]
    wo_ref  : (E, E)       bf16  out_proj weight^T (rows = head-major ctx features)
    bo_ref  : (1, E)       f32   out_proj bias
    o_ref   : (tq, E)            output rows of this query tile
    kv_ref  : (T_pad, 2E)  bf16  VMEM scratch holding [K | V] of the current batch
    """
    qi = pl.program_id(1)
    D = head_dim
    E = num_heads * head_dim
    n_chunks = seq_pad // q_tile

    # --- K/V projection over the full (padded) sequence: computed once per
    # batch element (qi == 0) and reused across all query tiles.  Chunked so
    # the f32 matmul temp stays (tq, 2E) instead of (T_pad, 2E).
    @pl.when(qi == 0)
    def _():
        wkv = wkv_ref[...]                                       # (E, 2E) bf16
        bkv = bkv_ref[...]                                       # (1, 2E) f32
        for c in range(n_chunks):                                # static unroll
            xc = x_ref[pl.ds(c * q_tile, q_tile), :]             # (tq, E) bf16
            kv = jnp.dot(xc, wkv, preferred_element_type=jnp.float32) + bkv
            kv_ref[pl.ds(c * q_tile, q_tile), :] = kv.astype(jnp.bfloat16)

    # --- Q projection for this query tile (scaling pre-folded into wq/bq).
    row0 = pl.multiple_of(qi * q_tile, q_tile)
    xq = x_ref[pl.ds(row0, q_tile), :]                           # (tq, E) bf16
    q = jnp.dot(xq, wq_ref[...], preferred_element_type=jnp.float32) + bq_ref[...]
    q = q.astype(jnp.bfloat16)                                   # (tq, E)

    # Key-padding mask, only materialized when the host padded the sequence.
    masked = seq_pad != seq_len
    if masked:
        kmask = lax.broadcasted_iota(jnp.int32, (1, seq_pad), 1) < seq_len

    # --- per-head attention.  Score and PV matmuls take bf16 operands with f32
    # accumulation; softmax stays f32; the reciprocal runs on the EUP slot.
    ctx_parts = []
    for h in range(num_heads):                                   # static unroll
        qh = q[:, h * D:(h + 1) * D]                             # (tq, D)    bf16
        kh = kv_ref[:, h * D:(h + 1) * D]                        # (T_pad, D) bf16
        vh = kv_ref[:, E + h * D:E + (h + 1) * D]                # (T_pad, D) bf16
        s = lax.dot_general(qh, kh, dimension_numbers=(((1,), (1,)), ((), ())),
                            preferred_element_type=jnp.float32)  # (tq, T_pad)
        if masked:
            s = jnp.where(kmask, s, jnp.float32(-1e30))
        s = s - jnp.max(s, axis=-1, keepdims=True)
        p = jnp.exp(s)
        # approx=True: ~1e-3 rel. error; set False for strict f32-parity needs.
        p = p * pl.reciprocal(jnp.sum(p, axis=-1, keepdims=True), approx=True)
        ctx_parts.append(jnp.dot(p.astype(jnp.bfloat16), vh,
                                 preferred_element_type=jnp.float32))
    ctx = jnp.concatenate(ctx_parts, axis=-1).astype(jnp.bfloat16)  # (tq, E)

    # --- one dense out_proj per query tile: full-E contraction on the MXU,
    # no per-head f32 accumulator read-modify-write.
    out = jnp.dot(ctx, wo_ref[...], preferred_element_type=jnp.float32) + bo_ref[...]
    o_ref[...] = out.astype(o_ref.dtype)


def prepare_whisper_attention_params(params, *, num_heads,
                                     compute_dtype=jnp.bfloat16):
    """One-time host-side parameter transform; call once, reuse every step.

    torch Linear weights are (out_features, in_features); the kernel wants
    (in, out) layouts with head-major output columns, the attention scaling
    folded into Wq/bq, K|V fused along the output dim, and bf16 weights.
    """
    embed_dim = params["q_proj_weight"].shape[0]
    head_dim = embed_dim // num_heads
    assert head_dim * num_heads == embed_dim
    scaling = head_dim ** (-0.5)

    wq = (params["q_proj_weight"].T * scaling).astype(compute_dtype)        # (E, E)
    bq = (params["q_proj_bias"] * scaling).reshape(1, embed_dim).astype(jnp.float32)

    wkv = jnp.concatenate([params["k_proj_weight"].T,
                           params["v_proj_weight"].T], axis=1).astype(compute_dtype)  # (E, 2E)
    bkv = jnp.concatenate([jnp.zeros((embed_dim,), jnp.float32),            # k: no bias
                           params["v_proj_bias"].astype(jnp.float32)]
                          ).reshape(1, 2 * embed_dim)

    wo = params["out_proj_weight"].T.astype(compute_dtype)                  # (E, E)
    bo = params["out_proj_bias"].reshape(1, embed_dim).astype(jnp.float32)

    return {"wq": wq, "bq": bq, "wkv": wkv, "bkv": bkv, "wo": wo, "bo": bo}


@functools.partial(jax.jit, static_argnames=("num_heads", "q_tile", "out_dtype"))
def whisper_attention(hidden_states, prepped, *, num_heads, q_tile=128,
                      out_dtype=None):
    """hidden_states: (bsz, tgt_len, embed_dim).  Returns (out, None, None)."""
    wq, bq, wkv, bkv, wo, bo = (prepped["wq"], prepped["bq"], prepped["wkv"],
                                prepped["bkv"], prepped["wo"], prepped["bo"])
    bsz, tgt_len, embed_dim = hidden_states.shape
    head_dim = embed_dim // num_heads
    assert head_dim * num_heads == embed_dim

    # Query tile: multiple of 8; short sequences use a single tile.  The
    # sequence is padded to a multiple of the tile and padded key positions
    # are masked inside the kernel.
    tq = min(_round_up(q_tile, 8), _round_up(tgt_len, 8))
    seq_pad = _round_up(tgt_len, tq)
    num_qt = seq_pad // tq
    odt = hidden_states.dtype if out_dtype is None else out_dtype

    # bf16 activations into the kernel: halves the input DMA bytes.
    x = hidden_states.astype(wq.dtype)
    if seq_pad != tgt_len:
        x = jnp.pad(x, ((0, 0), (0, seq_pad - tgt_len), (0, 0)))

    # Scoped-VMEM budget: double-buffered blocks, KV scratch and in-kernel f32
    # temps, clamped below this chip's queried VMEM capacity (128 MiB on
    # v5e/v6e, 64 MiB on v7x) with headroom for compiler scratch.
    bf16_b, f32_b = 2, 4
    odt_b = jnp.dtype(odt).itemsize
    est = (2 * seq_pad * embed_dim * bf16_b            # x block
           + 2 * 4 * embed_dim * embed_dim * bf16_b    # wq + wkv + wo blocks
           + 2 * 4 * embed_dim * f32_b                 # biases
           + 2 * tq * embed_dim * odt_b                # output block
           + seq_pad * 2 * embed_dim * bf16_b          # KV scratch
           + tq * 2 * embed_dim * f32_b                # KV-projection f32 temp
           + 3 * tq * seq_pad * f32_b                  # score / prob temps
           + 4 * tq * embed_dim * f32_b)               # q / ctx / out temps
    vmem_limit = int(min(max(est + (16 << 20), 48 << 20),
                         max(_VMEM_CAP_BYTES - (8 << 20), 32 << 20)))

    kernel = functools.partial(
        _whisper_attn_kernel, num_heads=num_heads, head_dim=head_dim,
        q_tile=tq, seq_len=tgt_len, seq_pad=seq_pad)

    out = pl.pallas_call(
        kernel,
        out_shape=jax.ShapeDtypeStruct((bsz, seq_pad, embed_dim), odt),
        grid_spec=pltpu.PrefetchScalarGridSpec(
            num_scalar_prefetch=0,
            grid=(bsz, num_qt),
            in_specs=[
                # Full (padded) hidden states of batch b: constant over the
                # query-tile axis -> DMA'd once per batch element.
                pl.BlockSpec((None, seq_pad, embed_dim), lambda b, qi: (b, 0, 0)),
                # Weights / biases: constant index maps -> VMEM-resident.
                pl.BlockSpec((embed_dim, embed_dim), lambda b, qi: (0, 0)),
                pl.BlockSpec((1, embed_dim), lambda b, qi: (0, 0)),
                pl.BlockSpec((embed_dim, 2 * embed_dim), lambda b, qi: (0, 0)),
                pl.BlockSpec((1, 2 * embed_dim), lambda b, qi: (0, 0)),
                pl.BlockSpec((embed_dim, embed_dim), lambda b, qi: (0, 0)),
                pl.BlockSpec((1, embed_dim), lambda b, qi: (0, 0)),
            ],
            out_specs=pl.BlockSpec((None, tq, embed_dim),
                                   lambda b, qi: (b, qi, 0)),
            scratch_shapes=[pltpu.VMEM((seq_pad, 2 * embed_dim), jnp.bfloat16)],
        ),
        compiler_params=pltpu.CompilerParams(
            # K/V are computed once per batch (qi == 0) and reused across query
            # tiles, so the qi axis must remain "arbitrary"; batch is parallel.
            dimension_semantics=("parallel", "arbitrary"),
            vmem_limit_bytes=vmem_limit),
    )(x, wq, bq, wkv, bkv, wo, bo)

    if seq_pad != tgt_len:
        out = out[:, :tgt_len, :]

    # Module returns (attn_output, attn_weights_reshaped, past_key_value);
    # for output_attentions=False and is_decoder=False both extras are None.
    return out, None, None


def _reference(hidden_states, params, *, num_heads):
    """Pure-JAX (f32) reference of the same forward pass."""
    bsz, tgt_len, embed_dim = hidden_states.shape
    head_dim = embed_dim // num_heads
    scaling = head_dim ** (-0.5)

    def lin(x, w, b=None):
        y = jnp.einsum("bte,oe->bto", x, w)
        return y if b is None else y + b

    q = lin(hidden_states, params["q_proj_weight"], params["q_proj_bias"]) * scaling
    k = lin(hidden_states, params["k_proj_weight"])
    v = lin(hidden_states, params["v_proj_weight"], params["v_proj_bias"])

    def heads(x):
        return x.reshape(bsz, tgt_len, num_heads, head_dim).transpose(0, 2, 1, 3)

    qh, kh, vh = heads(q), heads(k), heads(v)
    s = jnp.einsum("bhqd,bhkd->bhqk", qh, kh)
    p = jax.nn.softmax(s, axis=-1)
    o = jnp.einsum("bhqk,bhkd->bhqd", p, vh)
    o = o.transpose(0, 2, 1, 3).reshape(bsz, tgt_len, embed_dim)
    return lin(o, params["out_proj_weight"], params["out_proj_bias"])


if __name__ == "__main__":
    def _make_params(key, embed_dim):
        ks = jax.random.split(key, 7)
        s = 0.05
        n = lambda k, shp: s * jax.random.normal(k, shp, jnp.float32)
        return {
            "q_proj_weight": n(ks[0], (embed_dim, embed_dim)),
            "q_proj_bias": n(ks[1], (embed_dim,)),
            "k_proj_weight": n(ks[2], (embed_dim, embed_dim)),
            "v_proj_weight": n(ks[3], (embed_dim, embed_dim)),
            "v_proj_bias": n(ks[4], (embed_dim,)),
            "out_proj_weight": n(ks[5], (embed_dim, embed_dim)),
            "out_proj_bias": n(ks[6], (embed_dim,)),
        }

    key = jax.random.PRNGKey(0)
    k_param, k_x1, k_x2 = jax.random.split(key, 3)

    # One-time parameter prep (fused K|V, (in,out) head-major layout, bf16,
    # scaling folded into Wq/bq) -- hoisted out of the per-call path.
    bsz, tgt_len, embed_dim, num_heads = 2, 8, 32, 4
    params = _make_params(k_param, embed_dim)
    prepped = prepare_whisper_attention_params(params, num_heads=num_heads)

    # Case 1: small shapes, single query tile, no padding.
    hidden_states = jax.random.normal(k_x1, (bsz, tgt_len, embed_dim), jnp.float32)
    attn_out, attn_w, past_kv = whisper_attention(hidden_states, prepped,
                                                  num_heads=num_heads)
    attn_out = jax.block_until_ready(attn_out)
    ref = _reference(hidden_states, params, num_heads=num_heads)
    max_err = float(jnp.max(jnp.abs(attn_out - ref)))
    assert attn_out.shape == hidden_states.shape
    assert jnp.allclose(attn_out, ref, atol=2e-2, rtol=2e-2), (
        f"case1 mismatch vs reference, max abs err = {max_err}")
    assert attn_w is None and past_kv is None

    # Case 2: exercises query tiling, KV-scratch reuse across tiles and the
    # key-padding mask (tgt_len not a multiple of the query tile).
    tgt_len2 = 20
    hidden_states2 = jax.random.normal(k_x2, (1, tgt_len2, embed_dim), jnp.float32)
    out2, _, _ = whisper_attention(hidden_states2, prepped,
                                   num_heads=num_heads, q_tile=8)
    out2 = jax.block_until_ready(out2)
    ref2 = _reference(hidden_states2, params, num_heads=num_heads)
    max_err2 = float(jnp.max(jnp.abs(out2 - ref2)))
    assert out2.shape == hidden_states2.shape
    assert jnp.allclose(out2, ref2, atol=2e-2, rtol=2e-2), (
        f"case2 mismatch vs reference, max abs err = {max_err2}")

    # TODO(synk): cross-attention (key_value_states), past_key_value KV-cache,
    # attention_mask, layer_head_mask, output_attentions and dropout branches
    # of the module are not implemented (self-attention inference path only).
    print("KERNEL_OK")
</pallas_src>

<mosaic_0001>
module attributes {stable_mosaic.version = 11 : i64} {
  func.func @_whisper_attn_kernel(%arg0: i32, %arg1: i32, %arg2: memref<1x8x32xbf16, #tpu.memory_space<vmem>>, %arg3: memref<32x32xbf16, #tpu.memory_space<vmem>>, %arg4: memref<1x32xf32, #tpu.memory_space<vmem>>, %arg5: memref<32x64xbf16, #tpu.memory_space<vmem>>, %arg6: memref<1x64xf32, #tpu.memory_space<vmem>>, %arg7: memref<32x32xbf16, #tpu.memory_space<vmem>>, %arg8: memref<1x32xf32, #tpu.memory_space<vmem>>, %arg9: memref<1x8x32xf32, #tpu.memory_space<vmem>>, %arg10: memref<8x64xbf16, #tpu.memory_space<vmem>>) attributes {dimension_semantics = [#tpu.dimension_semantics<parallel>, #tpu.dimension_semantics<arbitrary>], iteration_bounds = array<i64: 2, 1>, scalar_prefetch = 0 : i64, scratch_operands = 1 : i64, tpu.core_type = #tpu.core_type<tc>, window_params = [{transform_indices = @transform_0, window_bounds = array<i64: 1, 8, 32>}, {pipeline_mode = #tpu.pipeline_mode<synchronous>, transform_indices = @transform_1, window_bounds = array<i64: 32, 32>}, {pipeline_mode = #tpu.pipeline_mode<synchronous>, transform_indices = @transform_2, window_bounds = array<i64: 1, 32>}, {pipeline_mode = #tpu.pipeline_mode<synchronous>, transform_indices = @transform_3, window_bounds = array<i64: 32, 64>}, {pipeline_mode = #tpu.pipeline_mode<synchronous>, transform_indices = @transform_4, window_bounds = array<i64: 1, 64>}, {pipeline_mode = #tpu.pipeline_mode<synchronous>, transform_indices = @transform_5, window_bounds = array<i64: 32, 32>}, {pipeline_mode = #tpu.pipeline_mode<synchronous>, transform_indices = @transform_6, window_bounds = array<i64: 1, 32>}, {transform_indices = @transform_7, window_bounds = array<i64: 1, 8, 32>}]} {
    %c0_i32 = arith.constant 0 : i32
    %0 = arith.cmpi eq, %arg1, %c0_i32 : i32
    %1 = arith.extui %0 : i1 to i32
    %c0_i32_0 = arith.constant 0 : i32
    %2 = arith.cmpi ne, %1, %c0_i32_0 : i32
    scf.if %2 {
      %c0_39 = arith.constant 0 : index
      %c0_40 = arith.constant 0 : index
      %88 = vector.load %arg5[%c0_39, %c0_40] : memref<32x64xbf16, #tpu.memory_space<vmem>>, vector<32x64xbf16>
      %c0_41 = arith.constant 0 : index
      %c0_42 = arith.constant 0 : index
      %89 = vector.load %arg6[%c0_41, %c0_42] : memref<1x64xf32, #tpu.memory_space<vmem>>, vector<1x64xf32>
      %c0_43 = arith.constant 0 : index
      %c0_44 = arith.constant 0 : index
      %c0_45 = arith.constant 0 : index
      %90 = vector.load %arg2[%c0_43, %c0_44, %c0_45] : memref<1x8x32xbf16, #tpu.memory_space<vmem>>, vector<1x8x32xbf16>
      %91 = vector.shape_cast %90 : vector<1x8x32xbf16> to vector<8x32xbf16>
      %cst_46 = arith.constant dense<0.000000e+00> : vector<8x64xf32>
      %92 = tpu.matmul %91, %88, %cst_46 {dimension_numbers = #tpu.dot_dimension_numbers<[1], [0], [0], [1], [0, 0, 1, 1], [], []>} : vector<8x32xbf16>, vector<32x64xbf16>, vector<8x64xf32> -> vector<8x64xf32>
      %93 = vector.broadcast %89 : vector<1x64xf32> to vector<8x64xf32>
      %94 = arith.addf %92, %93 : vector<8x64xf32>
      %95 = arith.truncf %94 : vector<8x64xf32> to vector<8x64xbf16>
      %c0_47 = arith.constant 0 : index
      %c0_48 = arith.constant 0 : index
      %96 = vector.load %arg10[%c0_47, %c0_48] : memref<8x64xbf16, #tpu.memory_space<vmem>>, vector<8x64xbf16>
      tpu.vector_store %arg10[%c0_47, %c0_48], %95 {strides = array<i32>} : memref<8x64xbf16, #tpu.memory_space<vmem>>, vector<8x64xbf16>,
    } else {
    }
    %c8_i32 = arith.constant 8 : i32
    %3 = arith.muli %arg1, %c8_i32 : i32
    %4 = tpu.assume_multiple %3, 8 : i32
    %c0 = arith.constant 0 : index
    %5 = arith.index_cast %4 : i32 to index
    %c0_1 = arith.constant 0 : index
    %6 = vector.load %arg2[%c0, %5, %c0_1] : memref<1x8x32xbf16, #tpu.memory_space<vmem>>, vector<1x8x32xbf16>
    %7 = vector.shape_cast %6 : vector<1x8x32xbf16> to vector<8x32xbf16>
    %c0_2 = arith.constant 0 : index
    %c0_3 = arith.constant 0 : index
    %8 = vector.load %arg3[%c0_2, %c0_3] : memref<32x32xbf16, #tpu.memory_space<vmem>>, vector<32x32xbf16>
    %cst = arith.constant dense<0.000000e+00> : vector<8x32xf32>
    %9 = tpu.matmul %7, %8, %cst {dimension_numbers = #tpu.dot_dimension_numbers<[1], [0], [0], [1], [0, 0, 1, 1], [], []>} : vector<8x32xbf16>, vector<32x32xbf16>, vector<8x32xf32> -> vector<8x32xf32>
    %c0_4 = arith.constant 0 : index
    %c0_5 = arith.constant 0 : index
    %10 = vector.load %arg4[%c0_4, %c0_5] : memref<1x32xf32, #tpu.memory_space<vmem>>, vector<1x32xf32>
    %11 = vector.broadcast %10 : vector<1x32xf32> to vector<8x32xf32>
    %12 = arith.addf %9, %11 : vector<8x32xf32>
    %13 = arith.truncf %12 : vector<8x32xf32> to vector<8x32xbf16>
    %14 = vector.extract_strided_slice %13 {offsets = [0, 0], sizes = [8, 8], strides = [1, 1]} : vector<8x32xbf16> to vector<8x8xbf16>
    %c0_6 = arith.constant 0 : index
    %c0_7 = arith.constant 0 : index
    %15 = vector.load %arg10[%c0_6, %c0_7] : memref<8x64xbf16, #tpu.memory_space<vmem>>, vector<8x8xbf16>
    %c0_8 = arith.constant 0 : index
    %c32 = arith.constant 32 : index
    %16 = vector.load %arg10[%c0_8, %c32] : memref<8x64xbf16, #tpu.memory_space<vmem>>, vector<8x8xbf16>
    %cst_9 = arith.constant dense<0.000000e+00> : vector<8x8xf32>
    %17 = tpu.matmul %14, %15, %cst_9 {dimension_numbers = #tpu.dot_dimension_numbers<[1], [1], [0], [0], [0, 0, 1, 0], [], []>} : vector<8x8xbf16>, vector<8x8xbf16>, vector<8x8xf32> -> vector<8x8xf32>
    %cst_10 = arith.constant dense<0xFF800000> : vector<8xf32>
    %18 = vector.multi_reduction <maximumf>, %17, %cst_10 [1] : vector<8x8xf32> to vector<8xf32>
    %19 = vector.shape_cast %18 : vector<8xf32> to vector<8x1xf32>
    %20 = vector.broadcast %19 : vector<8x1xf32> to vector<8x8xf32>
    %21 = arith.subf %17, %20 : vector<8x8xf32>
    %22 = math.exp %21 : vector<8x8xf32>
    %cst_11 = arith.constant dense<0.000000e+00> : vector<8xf32>
    %23 = vector.multi_reduction <add>, %22, %cst_11 [1] : vector<8x8xf32> to vector<8xf32>
    %24 = vector.shape_cast %23 : vector<8xf32> to vector<8x1xf32>
    %25 = tpu.reciprocal %24 {approx = true} : vector<8x1xf32> -> vector<8x1xf32>
    %26 = vector.broadcast %25 : vector<8x1xf32> to vector<8x8xf32>
    %27 = arith.mulf %22, %26 : vector<8x8xf32>
    %28 = arith.truncf %27 : vector<8x8xf32> to vector<8x8xbf16>
    %cst_12 = arith.constant dense<0.000000e+00> : vector<8x8xf32>
    %29 = tpu.matmul %28, %16, %cst_12 {dimension_numbers = #tpu.dot_dimension_numbers<[1], [0], [0], [1], [0, 0, 1, 1], [], []>} : vector<8x8xbf16>, vector<8x8xbf16>, vector<8x8xf32> -> vector<8x8xf32>
    %30 = vector.extract_strided_slice %13 {offsets = [0, 8], sizes = [8, 8], strides = [1, 1]} : vector<8x32xbf16> to vector<8x8xbf16>
    %c0_13 = arith.constant 0 : index
    %c8 = arith.constant 8 : index
    %31 = vector.load %arg10[%c0_13, %c8] : memref<8x64xbf16, #tpu.memory_space<vmem>>, vector<8x8xbf16>
    %c0_14 = arith.constant 0 : index
    %c40 = arith.constant 40 : index
    %32 = vector.load %arg10[%c0_14, %c40] : memref<8x64xbf16, #tpu.memory_space<vmem>>, vector<8x8xbf16>
    %cst_15 = arith.constant dense<0.000000e+00> : vector<8x8xf32>
    %33 = tpu.matmul %30, %31, %cst_15 {dimension_numbers = #tpu.dot_dimension_numbers<[1], [1], [0], [0], [0, 0, 1, 0], [], []>} : vector<8x8xbf16>, vector<8x8xbf16>, vector<8x8xf32> -> vector<8x8xf32>
    %cst_16 = arith.constant dense<0xFF800000> : vector<8xf32>
    %34 = vector.multi_reduction <maximumf>, %33, %cst_16 [1] : vector<8x8xf32> to vector<8xf32>
    %35 = vector.shape_cast %34 : vector<8xf32> to vector<8x1xf32>
    %36 = vector.broadcast %35 : vector<8x1xf32> to vector<8x8xf32>
    %37 = arith.subf %33, %36 : vector<8x8xf32>
    %38 = math.exp %37 : vector<8x8xf32>
    %cst_17 = arith.constant dense<0.000000e+00> : vector<8xf32>
    %39 = vector.multi_reduction <add>, %38, %cst_17 [1] : vector<8x8xf32> to vector<8xf32>
    %40 = vector.shape_cast %39 : vector<8xf32> to vector<8x1xf32>
    %41 = tpu.reciprocal %40 {approx = true} : vector<8x1xf32> -> vector<8x1xf32>
    %42 = vector.broadcast %41 : vector<8x1xf32> to vector<8x8xf32>
    %43 = arith.mulf %38, %42 : vector<8x8xf32>
    %44 = arith.truncf %43 : vector<8x8xf32> to vector<8x8xbf16>
    %cst_18 = arith.constant dense<0.000000e+00> : vector<8x8xf32>
    %45 = tpu.matmul %44, %32, %cst_18 {dimension_numbers = #tpu.dot_dimension_numbers<[1], [0], [0], [1], [0, 0, 1, 1], [], []>} : vector<8x8xbf16>, vector<8x8xbf16>, vector<8x8xf32> -> vector<8x8xf32>
    %46 = vector.extract_strided_slice %13 {offsets = [0, 16], sizes = [8, 8], strides = [1, 1]} : vector<8x32xbf16> to vector<8x8xbf16>
    %c0_19 = arith.constant 0 : index
    %c16 = arith.constant 16 : index
    %47 = vector.load %arg10[%c0_19, %c16] : memref<8x64xbf16, #tpu.memory_space<vmem>>, vector<8x8xbf16>
    %c0_20 = arith.constant 0 : index
    %c48 = arith.constant 48 : index
    %48 = vector.load %arg10[%c0_20, %c48] : memref<8x64xbf16, #tpu.memory_space<vmem>>, vector<8x8xbf16>
    %cst_21 = arith.constant dense<0.000000e+00> : vector<8x8xf32>
    %49 = tpu.matmul %46, %47, %cst_21 {dimension_numbers = #tpu.dot_dimension_numbers<[1], [1], [0], [0], [0, 0, 1, 0], [], []>} : vector<8x8xbf16>, vector<8x8xbf16>, vector<8x8xf32> -> vector<8x8xf32>
    %cst_22 = arith.constant dense<0xFF800000> : vector<8xf32>
    %50 = vector.multi_reduction <maximumf>, %49, %cst_22 [1] : vector<8x8xf32> to vector<8xf32>
    %51 = vector.shape_cast %50 : vector<8xf32> to vector<8x1xf32>
    %52 = vector.broadcast %51 : vector<8x1xf32> to vector<8x8xf32>
    %53 = arith.subf %49, %52 : vector<8x8xf32>
    %54 = math.exp %53 : vector<8x8xf32>
    %cst_23 = arith.constant dense<0.000000e+00> : vector<8xf32>
    %55 = vector.multi_reduction <add>, %54, %cst_23 [1] : vector<8x8xf32> to vector<8xf32>
    %56 = vector.shape_cast %55 : vector<8xf32> to vector<8x1xf32>
    %57 = tpu.reciprocal %56 {approx = true} : vector<8x1xf32> -> vector<8x1xf32>
    %58 = vector.broadcast %57 : vector<8x1xf32> to vector<8x8xf32>
    %59 = arith.mulf %54, %58 : vector<8x8xf32>
    %60 = arith.truncf %59 : vector<8x8xf32> to vector<8x8xbf16>
    %cst_24 = arith.constant dense<0.000000e+00> : vector<8x8xf32>
    %61 = tpu.matmul %60, %48, %cst_24 {dimension_numbers = #tpu.dot_dimension_numbers<[1], [0], [0], [1], [0, 0, 1, 1], [], []>} : vector<8x8xbf16>, vector<8x8xbf16>, vector<8x8xf32> -> vector<8x8xf32>
    %62 = vector.extract_strided_slice %13 {offsets = [0, 24], sizes = [8, 8], strides = [1, 1]} : vector<8x32xbf16> to vector<8x8xbf16>
    %c0_25 = arith.constant 0 : index
    %c24 = arith.constant 24 : index
    %63 = vector.load %arg10[%c0_25, %c24] : memref<8x64xbf16, #tpu.memory_space<vmem>>, vector<8x8xbf16>
    %c0_26 = arith.constant 0 : index
    %c56 = arith.constant 56 : index
    %64 = vector.load %arg10[%c0_26, %c56] : memref<8x64xbf16, #tpu.memory_space<vmem>>, vector<8x8xbf16>
    %cst_27 = arith.constant dense<0.000000e+00> : vector<8x8xf32>
    %65 = tpu.matmul %62, %63, %cst_27 {dimension_numbers = #tpu.dot_dimension_numbers<[1], [1], [0], [0], [0, 0, 1, 0], [], []>} : vector<8x8xbf16>, vector<8x8xbf16>, vector<8x8xf32> -> vector<8x8xf32>
    %cst_28 = arith.constant dense<0xFF800000> : vector<8xf32>
    %66 = vector.multi_reduction <maximumf>, %65, %cst_28 [1] : vector<8x8xf32> to vector<8xf32>
    %67 = vector.shape_cast %66 : vector<8xf32> to vector<8x1xf32>
    %68 = vector.broadcast %67 : vector<8x1xf32> to vector<8x8xf32>
    %69 = arith.subf %65, %68 : vector<8x8xf32>
    %70 = math.exp %69 : vector<8x8xf32>
    %cst_29 = arith.constant dense<0.000000e+00> : vector<8xf32>
    %71 = vector.multi_reduction <add>, %70, %cst_29 [1] : vector<8x8xf32> to vector<8xf32>
    %72 = vector.shape_cast %71 : vector<8xf32> to vector<8x1xf32>
    %73 = tpu.reciprocal %72 {approx = true} : vector<8x1xf32> -> vector<8x1xf32>
    %74 = vector.broadcast %73 : vector<8x1xf32> to vector<8x8xf32>
    %75 = arith.mulf %70, %74 : vector<8x8xf32>
    %76 = arith.truncf %75 : vector<8x8xf32> to vector<8x8xbf16>
    %cst_30 = arith.constant dense<0.000000e+00> : vector<8x8xf32>
    %77 = tpu.matmul %76, %64, %cst_30 {dimension_numbers = #tpu.dot_dimension_numbers<[1], [0], [0], [1], [0, 0, 1, 1], [], []>} : vector<8x8xbf16>, vector<8x8xbf16>, vector<8x8xf32> -> vector<8x8xf32>
    %78 = tpu.concatenate %29, %45, %61, %77 in 1 : vector<8x8xf32>, vector<8x8xf32>, vector<8x8xf32>, vector<8x8xf32> -> vector<8x32xf32>
    %79 = arith.truncf %78 : vector<8x32xf32> to vector<8x32xbf16>
    %c0_31 = arith.constant 0 : index
    %c0_32 = arith.constant 0 : index
    %80 = vector.load %arg7[%c0_31, %c0_32] : memref<32x32xbf16, #tpu.memory_space<vmem>>, vector<32x32xbf16>
    %cst_33 = arith.constant dense<0.000000e+00> : vector<8x32xf32>
    %81 = tpu.matmul %79, %80, %cst_33 {dimension_numbers = #tpu.dot_dimension_numbers<[1], [0], [0], [1], [0, 0, 1, 1], [], []>} : vector<8x32xbf16>, vector<32x32xbf16>, vector<8x32xf32> -> vector<8x32xf32>
    %c0_34 = arith.constant 0 : index
    %c0_35 = arith.constant 0 : index
    %82 = vector.load %arg8[%c0_34, %c0_35] : memref<1x32xf32, #tpu.memory_space<vmem>>, vector<1x32xf32>
    %83 = vector.broadcast %82 : vector<1x32xf32> to vector<8x32xf32>
    %84 = arith.addf %81, %83 : vector<8x32xf32>
    %c0_36 = arith.constant 0 : index
    %c0_37 = arith.constant 0 : index
    %c0_38 = arith.constant 0 : index
    %85 = vector.load %arg9[%c0_36, %c0_37, %c0_38] : memref<1x8x32xf32, #tpu.memory_space<vmem>>, vector<1x8x32xf32>
    %86 = vector.shape_cast %85 : vector<1x8x32xf32> to vector<8x32xf32>
    %87 = vector.shape_cast %84 : vector<8x32xf32> to vector<1x8x32xf32>
    tpu.vector_store %arg9[%c0_36, %c0_37, %c0_38], %87 {strides = array<i32>} : memref<1x8x32xf32, #tpu.memory_space<vmem>>, vector<1x8x32xf32>,
    return
  }
  func.func @transform_0(%arg0: i32, %arg1: i32) -> (i32, i32, i32) {
    %c0_i32 = arith.constant 0 : i32
    %c0_i32_0 = arith.constant 0 : i32
    %c0_i32_1 = arith.constant 0 : i32
    return %arg0, %c0_i32, %c0_i32_0 : i32, i32, i32
  }
  func.func @transform_1(%arg0: i32, %arg1: i32) -> (i32, i32) {
    %c0_i32 = arith.constant 0 : i32
    %c0_i32_0 = arith.constant 0 : i32
    %c0_i32_1 = arith.constant 0 : i32
    return %c0_i32, %c0_i32_0 : i32, i32
  }
  func.func @transform_2(%arg0: i32, %arg1: i32) -> (i32, i32) {
    %c0_i32 = arith.constant 0 : i32
    %c0_i32_0 = arith.constant 0 : i32
    %c0_i32_1 = arith.constant 0 : i32
    return %c0_i32, %c0_i32_0 : i32, i32
  }
  func.func @transform_3(%arg0: i32, %arg1: i32) -> (i32, i32) {
    %c0_i32 = arith.constant 0 : i32
    %c0_i32_0 = arith.constant 0 : i32
    %c0_i32_1 = arith.constant 0 : i32
    return %c0_i32, %c0_i32_0 : i32, i32
  }
  func.func @transform_4(%arg0: i32, %arg1: i32) -> (i32, i32) {
    %c0_i32 = arith.constant 0 : i32
    %c0_i32_0 = arith.constant 0 : i32
    %c0_i32_1 = arith.constant 0 : i32
    return %c0_i32, %c0_i32_0 : i32, i32
  }
  func.func @transform_5(%arg0: i32, %arg1: i32) -> (i32, i32) {
    %c0_i32 = arith.constant 0 : i32
    %c0_i32_0 = arith.constant 0 : i32
    %c0_i32_1 = arith.constant 0 : i32
    return %c0_i32, %c0_i32_0 : i32, i32
  }
  func.func @transform_6(%arg0: i32, %arg1: i32) -> (i32, i32) {
    %c0_i32 = arith.constant 0 : i32
    %c0_i32_0 = arith.constant 0 : i32
    %c0_i32_1 = arith.constant 0 : i32
    return %c0_i32, %c0_i32_0 : i32, i32
  }
  func.func @transform_7(%arg0: i32, %arg1: i32) -> (i32, i32, i32) {
    %c0_i32 = arith.constant 0 : i32
    %c0_i32_0 = arith.constant 0 : i32
    return %arg0, %arg1, %c0_i32 : i32, i32, i32
  }
}

</mosaic_0001>

<bundles_post_ra>
// kernel: whisper_attention.1
= control target key start
LH: loop header
LB: loop body
LE: loop exit
PB: predicated region body
PF: predicated region fallthrough
CT: control target
= control target key end

     0   :  { %12 = vsyncpa [#allocation4], 0  ;;  %s1353_s0 = inlined_call_operand.vmem [shape: bf16[2,8,32], index: 0, kind: input, shape index: {}]   ;;  %s1354_s1 = inlined_call_operand.vmem [shape: bf16[32,32], index: 1, kind: input, shape index: {}]   ;;  %s1355_s2 = inlined_call_operand.vmem [shape: f32[1,32], index: 2, kind: input, shape index: {}]   ;;  %s1356_s3 = inlined_call_operand.hbm [shape: bf16[32,64], index: 3, kind: input, shape index: {}]   ;;  %s1357_s4 = inlined_call_operand.vmem [shape: f32[1,64], index: 4, kind: input, shape index: {}]   ;;  %s1358_s5 = inlined_call_operand.hbm [shape: bf16[32,32], index: 5, kind: input, shape index: {}]   ;;  %s1359_s6 = inlined_call_operand.vmem [shape: f32[1,32], index: 6, kind: input, shape index: {}]   ;;  %s1360_s7 = inlined_call_operand.hbm [shape: f32[2,8,32], index: 7, kind: output, shape index: {}]  }
   0x1   :  { %13 = vsyncpa [#allocation7], 0 }
   0x2   :  { %14 = vsyncpa [#allocation5], 0 }
   0x3   :  { %16 = vsyncpa [#allocation5 + $0x1], 0  ;;  %s1170_s24 = smov 0   ;;  %s1172_s25 = smov 0  }
   0x4   :  { %s1174_s26 = smov 0   ;;  %s1176_s27 = smov 0  }
   0x5   :  { %s1178_s28 = smov 0   ;;  %s1180_s29 = smov 0  }
   0x6 LB: > { %s805_s30 = sadd.s32 4294967295, %s1114_s29   ;;  %s806_s8 = sadd.s32 4294967294, %s1114_s29   ;;  %s1114_s29 = sphi %s1180_s29, %s22_s29   ;;  %s1110_s28 = sphi %s1178_s28, %s1369_s28   ;;  %s1106_s27 = sphi %s1176_s27, %s1368_s27   ;;  %s1102_s26 = sphi %s1174_s26, %s1367_s26   ;;  %s1098_s25 = sphi %s1172_s25, %s1366_s25   ;;  %s1094_s24 = sphi %s1170_s24, %s1365_s24  }
   0x7   : > { %s34_s9 = sadd.s32 1, %s1110_s28  ;;  %s195_s10 = sadd.s32 1, %s1102_s26 }
   0x8   : > { %p36_p0 = scmp.ge.s32.totalorder %s34_s9, 2  ;;  %p205_p1 = scmp.ne.s32.totalorder %s1102_s26, %s1098_s25 }
   0x9   : > { %p206_p2 = scmp.eq.s32.totalorder %s805_s30, 1  ;;  %p211_p3 = scmp.ne.s32.totalorder %s1098_s25, %s1094_s24 }
   0xa   : > { %s1371_s9 = smov (%p36_p0, %s34_s9), 0  ;;  %p212_p5 = scmp.eq.s32.totalorder %s806_s8, 1 }
   0xb   : > { %p1210_p4 = por %p206_p2, %p205_p1  ;;  %s190_s12 = ssub.s32 %s1110_s28, %s1371_s9 }
   0xc   : > { %p807_p6 = scmp.ge.s32.totalorder %s1114_s29, 1  ;;  %p193_p7 = scmp.eq.s32.totalorder %s190_s12, 0 }
   0xd   : > { %p1217_p8 = por %p212_p5, %p211_p3  ;;  %p219_p9 = scmp.lt.s32.totalorder %s1114_s29, 3 }
   0xe   : > { %s1223_s14 = scalar_select %p193_p7, %s1102_s26, %s195_s10  }
   0xf   : > { %p1225_p10 = pnand %p807_p6, %p219_p9  ;;  %p1229_p11 = scmp.eq.s32.totalorder %s805_s30, 0 }
  0x10   : > { %s236_s19 = sshll.u32 %s1356_s3, 4  ;;  %s1116_s20 = smov [#allocation3]   ;;  %s237_s19 = int_to_ptr.hbm [resolvable:$true] %s236_s19 }
  0x11   : > { %p871_p12 = pneg %p1225_p10  ;;  %s238_s21 = sshll.u32 %s1116_s20, 4  ;;  %s239_s21 = int_to_ptr.vmem [resolvable:$true] %s238_s21 }
  0x12   : > { %s253_s30 = sshll.u32 %s1358_s5, 4  ;;  %s1117_s8 = smov 64   ;;  %s254_s30 = int_to_ptr.hbm [resolvable:$true] %s253_s30 }
  0x13   : > { %p872_p13 = pnand %p1229_p11, %p871_p12  ;;  %s1118_s10 = smov 4  }
  0x14   : > { %s1119_s12 = smov [#allocation6]   ;;  %281 = sbr.rel (%p1225_p10) target bundleno = 1361 (0x551), region = 48 }
  0x15   : > { %874 = dma.hbm_to_vmem [thread:$0]  (!%p872_p13), %s237_s19, 256, %s239_s21, [#allocation4], %s1117_s8, %s1117_s8, %s1118_s10  }
  0x16   : > { %s255_s17 = sshll.u32 %s1119_s12, 4  ;;  %s256_s17 = int_to_ptr.vmem [resolvable:$true] %s255_s17 }
  0x17   : > { %877 = dma.hbm_to_vmem [thread:$0]  (!%p872_p13), %s254_s30, 256, %s256_s17, [#allocation7], %s1117_s8, %s1117_s8, %s1118_s10  }
  0x19   : > { %1081 = dma.done.wait (%p1229_p11), [#allocation4], 256  }
  0x1a   : > { %1083 = vsyncadd (%p1229_p11), [#allocation4], 4294967040 }
  0x1b   : > { %1085 = dma.done.wait (%p1229_p11), [#allocation7], 256  }
  0x1c   : > { %1087 = vsyncadd (%p1229_p11), [#allocation7], 4294967040  ;;  %p318_p0 = scmp.lt.s32.totalorder %s1106_s27, 1  ;;  %v856_v0 = vld [vmem:[#allocation3 + $0x8] sm:$0xff]  ;;  %v855_v2 = vld [vmem:[#allocation3] sm:$0xff]  ;;  %vm348_vm0 = vcmask 261120  }
  0x1d   : > { %v858_v1 = vld [vmem:[%s1354_s1 + $0x8] sm:$0xff]  ;;  %358 = vmatpush.bf16.msra.mxu0 %v856_v0  ;;  %v857_v3 = vld [vmem:[%s1354_s1] sm:$0xff]  ;;  %vm366_vm1 = vcmask 519168   ;;  %vm413_vm2 = vcmask 64512   ;;  %s1121_s19 = smov 112   ;;  %s1122_s15 = smov 96  }
  0x1e   : > { %s319_s18 = scalar_select %p318_p0, %s1106_s27, 1  ;;  %404 = vmatpush.bf16.msra.mxu1 %v858_v1  ;;  %v949_v6 = vld [vmem:[%s1357_s4] ss:$0 sm:$0xff]  ;;  %vm453_vm3 = vcmask 1043456   ;;  %vm654_vm4 = vcmask 130048   ;;  %vm656_vm5 = vcmask 195584  }
  0x1f   : > { %v950_v7 = vld [vmem:[%s1355_s2] ss:$0 sm:$0xff]  ;;  %s1124_s21 = smov 88   ;;  %s1125_s22 = smov 80  }
  0x20   : > { %s815_s20 = sshll.u32 %s319_s18, 2  ;;  %s1120_s18 = smov 120  }
  0x21   : > { %s321_s30 = scalar_lea.vmem %s1353_s0, %s815_s20  ;;  %359 = vmatpush.bf16.msra.mxu0 %v855_v2  ;;  %s1123_s20 = smov 104  }
  0x22   : > { %405 = vmatpush.bf16.msra.mxu1 %v857_v3  ;;  %v332_v4 = vld [vmem:[%s321_s30] sm:$0xf]  ;;  %s1126_s23 = smov 72   ;;  %s1127_s16 = smov 8  }
  0x23   : > { %v373_v5 = vld [vmem:[%s321_s30] sm:$0xf]  ;;  %s1128_s30 = smov 16   ;;  %s1129_s8 = smov 24  }
  0x24   : > { %824 = vmatmul.msk.bf16.vlgmr.msra.gmra.mxu0 %vm348_vm0, %v332_v4  ;;  %s315_s10 = sand.u32 1, %s1098_s25   ;;  %s852_s12 = sshll.u32 %s1106_s27, 3 }
  0x25   : > { %833 = vmatmul.msk.bf16.vlgmr.msra.gmra.mxu1 %vm348_vm0, %v373_v5  ;;  %s814_s17 = sshll.u32 %s315_s10, 3  ;;  %s697_s27 = scalar_lea.sflag [#allocation5], %s315_s10 }
  0xa1   : > { %v361_v8 = vpop.f32.mrf.mxu0 }
  0xa2   : > { %v407_v9 = vpop.f32.mrf.mxu1  ;;  %v362_v10 = vadd.f32 %v949_v6, %v361_v8 }
  0xa3   : > { %v408_v11 = vadd.f32 %v950_v7, %v407_v9 }
  0xa4   : > { %v365_v12 = vpack.c.bf16 %v362_v10, %v362_v10 }
  0xa5   : > { %v411_v13 = vpack.c.bf16 %v408_v11, %v408_v11 }
  0xa6   : > { %367 = vst.msk [vmem:[#allocation2] sm:$0xf] %vm366_vm1, %v365_v12 }
  0xa7   : > { %v471_v14 = vunpack.c.l.b16 %v411_v13 }
  0xa9   : > { %v472_v15 = vpack.c.b16 %v471_v14, %v471_v14  ;;  %v363_v16 = vpop.f32.mrf.mxu0 }
  0xaa   : > { %v409_v17 = vpop.f32.mrf.mxu1 }
  0xab   : > { %473 = vrot.lane.b32.xlu2 %v472_v15, %s1120_s18 }
  0xad   : > { %v412_v18 = vld [vmem:[#allocation2] sm:$0xf] }
  0xae   : > { %v418_v19 = vsel %vm413_vm2, %v412_v18, 0  ;;  %v446_v20 = vunpack.c.l.b16 %v412_v18 }
  0xaf   : > { %427 = vmatpush.bf16.xpose.msra.mxu2 %v418_v19 }
  0xb0   : > { %v1273_v21 = vpack.c.b16 %v446_v20, %v446_v20 }
  0xb2   : > { %448 = vrot.lane.b32.xlu1 %v1273_v21, %s1122_s15  ;;  %s708_s15 = scalar_lea.hbm %s1360_s7, %s852_s12 }
  0xb3   : > { %531 = vrot.lane.b32.xlu2 %v1273_v21, %s1121_s19 }
  0xb6   : > { %834 = vmatmul.msk.bf16.vlgmr.msra.gmra.mxu2 %vm413_vm2, %v411_v13 }
  0xba   : > { %475 = vrot.lane.b32.xlu1 %v1273_v21, %s1120_s18 }
  0xbb   : > { %585 = vrot.lane.b32.xlu2 %v472_v15, %s1123_s20 }
  0xc2   : > { %529 = vrot.lane.b32.xlu1 %v472_v15, %s1121_s19 }
 0x105   : > { %v474_v22 = vpop.permute.xlu2 %473 }
 0x10d   : > { %v532_v23 = vpop.permute.xlu2 %531 }
 0x10e   : > { %v537_v24 = vsel %vm413_vm2, %v532_v23, 0 }
 0x10f   : > { %546 = vmatpush.bf16.xpose.msrb.mxu1 %v537_v24 }
 0x115   : > { %v586_v41 = vpop.permute.xlu2 %585 }
 0x124   : > { %v449_v25 = vpop.permute.xlu1 %448 }
 0x125   : > { %v455_v26 = vsel %vm453_vm3, %v449_v25, 0 }
 0x126   : > { %464 = vmatpush.bf16.msra.mxu3 %v455_v26 }
 0x12c   : > { %v476_v27 = vpop.permute.xlu1 %475 }
 0x12d   : > { %v481_v28 = vsel %vm413_vm2, %v476_v27, 0 }
 0x12e   : > { %490 = vmatpush.bf16.xpose.msrb.mxu3 %v481_v28 }
 0x134   : > { %v530_v29 = vpop.permute.xlu1 %529 }
 0x135   : > { %838 = vmatmul.msk.bf16.vlgmr.msrb.gmra.mxu1 %vm413_vm2, %v530_v29 }
 0x139   : > { %v429_v30 = vpop.f32.mrf.mxu2 }
 0x13a   : > { %v433_v31 = vsel %vm413_vm2, %v429_v30, -inf }
 0x13b   : > { %434 = vmax.xlane.f32.xlu0 %v433_v31  ;;  %v860_v31 = vld [vmem:[#allocation6 + $0x8] sm:$0xff] }
 0x13c   : > { %688 = vmatpush.bf16.msra.mxu1 %v860_v31 }
 0x141   : > { %v431_v32 = vpop.f32.mrf.mxu2 }
 0x142   : > { %v859_v32 = vld [vmem:[#allocation6] sm:$0xff] }
 0x143   : > { %689 = vmatpush.bf16.msra.mxu1 %v859_v32 }
 0x1ae   : > { %v435_v33 = vpop.xlane.xlu0 %434 }
 0x1af   : > { %v436_v34 = vsub.f32 %v429_v30, %v435_v33 }
 0x1b1   : > { %v437_v35 = vmul.f32 1.442695, %v436_v34 }
 0x1b2   : > { %v548_v36 = vpop.f32.mrf.mxu1 }
 0x1b3   : > { %952 = vpow2.f32 %v437_v35  ;;  %v552_v37 = vsel %vm413_vm2, %v548_v36, -inf }
 0x1b4   : > { %553 = vmax.xlane.f32.xlu2 %v552_v37 }
 0x1b9   : > { %v953_v38 = vpop.eup %952 }
 0x1ba   : > { %v550_v39 = vpop.f32.mrf.mxu1  ;;  %v439_v40 = vsel %vm413_vm2, %v953_v38, 0.0 }
 0x1bb   : > { %440 = vadd.xlane.f32.xlu0 %v439_v40  ;;  %v951_v40 = vld [vmem:[%s1359_s6] ss:$0 sm:$0xff] }
 0x1cf   : > { %587 = vrot.lane.b32.xlu0 %v1273_v21, %s1123_s20 }
 0x227   : > { %v554_v42 = vpop.xlane.xlu2 %553 }
 0x228   : > { %v555_v43 = vsub.f32 %v548_v36, %v554_v42 }
 0x22a   : > { %v556_v44 = vmul.f32 1.442695, %v555_v43 }
 0x22c   : > { %954 = vpow2.f32 %v556_v44 }
 0x22e   : > { %v441_v45 = vpop.xlane.xlu0 %440 }
 0x22f   : > { %956 = vrcp.f32 %v441_v45 }
 0x232   : > { %v955_v46 = vpop.eup %954 }
 0x233   : > { %v558_v47 = vsel %vm413_vm2, %v955_v46, 0.0 }
 0x234   : > { %559 = vadd.xlane.f32.xlu2 %v558_v47 }
 0x235   : > { %v957_v48 = vpop.eup %956 }
 0x236   : > { %v443_v49 = vmul.f32 %v957_v48, %v953_v38 }
 0x238   : > { %v444_v50 = vpack.c.bf16 %v443_v49, %v443_v49 }
 0x23a   : > { %835 = vmatmul.msk.bf16.vlgmr.msra.gmra.mxu3 %vm413_vm2, %v444_v50 }
 0x241   : > { %v588_v51 = vpop.permute.xlu0 %587 }
 0x242   : > { %v593_v52 = vsel %vm413_vm2, %v588_v51, 0 }
 0x243   : > { %602 = vmatpush.bf16.xpose.msra.mxu3 %v593_v52 }
 0x24a   : > { %836 = vmatmul.msk.bf16.vlgmr.msrb.gmra.mxu3 %vm413_vm2, %v474_v22 }
 0x25a   : > { %840 = vmatmul.msk.bf16.vlgmr.msra.gmra.mxu3 %vm413_vm2, %v586_v41 }
 0x2a7   : > { %v560_v9 = vpop.xlane.xlu2 %559 }
 0x2bd   : > { %v1294_v53 = vpop.f32.mrf.mxu3 }
 0x2c5   : > { %v468_v54 = vpop.f32.mrf.mxu3 }
 0x2cd   : > { %v492_v55 = vpop.f32.mrf.mxu3 }
 0x2ce   : > { %v496_v56 = vsel %vm413_vm2, %v492_v55, -inf }
 0x2cf   : > { %497 = vmax.xlane.f32.xlu1 %v496_v56 }
 0x2d5   : > { %v494_v57 = vpop.f32.mrf.mxu3 }
 0x2dd   : > { %v604_v58 = vpop.f32.mrf.mxu3 }
 0x2de   : > { %v608_v59 = vsel %vm413_vm2, %v604_v58, -inf }
 0x2df   : > { %609 = vmax.xlane.f32.xlu0 %v608_v59 }
 0x2e5   : > { %v606_v60 = vpop.f32.mrf.mxu3 }
 0x2e8   : > { %508 = vrot.lane.b32.xlu1 %v1273_v21, %s1124_s21 }
 0x342   : > { %v498_v61 = vpop.xlane.xlu1 %497 }
 0x343   : > { %v499_v62 = vsub.f32 %v492_v55, %v498_v61 }
 0x345   : > { %v500_v63 = vmul.f32 1.442695, %v499_v62 }
 0x347   : > { %958 = vpow2.f32 %v500_v63 }
 0x34d   : > { %v959_v0 = vpop.eup %958 }
 0x34e   : > { %v502_v1 = vsel %vm413_vm2, %v959_v0, 0.0 }
 0x34f   : > { %503 = vadd.xlane.f32.xlu2 %v502_v1 }
 0x352   : > { %v610_v2 = vpop.xlane.xlu0 %609 }
 0x353   : > { %v611_v3 = vsub.f32 %v604_v58, %v610_v2 }
 0x355   : > { %v612_v4 = vmul.f32 1.442695, %v611_v3 }
 0x357   : > { %960 = vpow2.f32 %v612_v4 }
 0x358   : > { %962 = vrcp.f32 %v560_v9 }
 0x35a   : > { %v509_v5 = vpop.permute.xlu1 %508 }
 0x35b   : > { %v514_v6 = vsel %vm453_vm3, %v509_v5, 0 }
 0x35c   : > { %523 = vmatpush.bf16.msrb.mxu0 %v514_v6 }
 0x35d   : > { %v961_v7 = vpop.eup %960 }
 0x35e   : > { %v614_v8 = vsel %vm413_vm2, %v961_v7, 0.0  ;;  %v963_v11 = vpop.eup %962 }
 0x35f   : > { %615 = vadd.xlane.f32.xlu0 %v614_v8  ;;  %v562_v13 = vmul.f32 %v963_v11, %v955_v46 }
 0x361   : > { %v563_v18 = vpack.c.bf16 %v562_v13, %v562_v13 }
 0x367   : > { %564 = vrot.lane.b32.xlu2 %v1273_v21, %s1125_s22  ;;  %s317_s22 = scalar_lea.vmem [#allocation8], %s814_s17  ;;  %s1048_s17 = scalar_lea.hbm %s1360_s7, 16 }
 0x373   : > { %620 = vrot.lane.b32.xlu0 %v1273_v21, %s1126_s23  ;;  %s710_s23 = sshll.u32 %s317_s22, 4  ;;  %s711_s23 = int_to_ptr.vmem [resolvable:$true] %s710_s23 }
 0x3c2   : > { %v504_v10 = vpop.xlane.xlu2 %503 }
 0x3c3   : > { %964 = vrcp.f32 %v504_v10 }
 0x3c9   : > { %v965_v12 = vpop.eup %964 }
 0x3ca   : > { %v506_v14 = vmul.f32 %v965_v12, %v959_v0  ;;  %v565_v15 = vpop.permute.xlu2 %564 }
 0x3cb   : > { %v570_v16 = vsel %vm453_vm3, %v565_v15, 0 }
 0x3cc   : > { %579 = vmatpush.bf16.msrb.mxu2 %v570_v16  ;;  %v507_v17 = vpack.c.bf16 %v506_v14, %v506_v14 }
 0x3ce   : > { %837 = vmatmul.msk.bf16.vlgmr.msrb.gmra.mxu0 %vm413_vm2, %v507_v17 }
 0x3cf   : > { %839 = vmatmul.msk.bf16.vlgmr.msrb.gmra.mxu2 %vm413_vm2, %v563_v18 }
 0x3d2   : > { %v616_v19 = vpop.xlane.xlu0 %615 }
 0x3d3   : > { %966 = vrcp.f32 %v616_v19 }
 0x3d9   : > { %v967_v20 = vpop.eup %966 }
 0x3da   : > { %v618_v21 = vmul.f32 %v967_v20, %v961_v7 }
 0x3dc   : > { %v619_v24 = vpack.c.bf16 %v618_v21, %v618_v21 }
 0x3e5   : > { %v621_v22 = vpop.permute.xlu0 %620 }
 0x3e6   : > { %v626_v23 = vsel %vm453_vm3, %v621_v22, 0 }
 0x3e7   : > { %635 = vmatpush.bf16.msra.mxu0 %v626_v23 }
 0x3ea   : > { %841 = vmatmul.msk.bf16.vlgmr.msra.gmra.mxu0 %vm413_vm2, %v619_v24 }
 0x44b   : > { %v525_v25 = vpop.f32.mrf.mxu0 }
 0x44c   : > { %642 = vrot.lane.b32.xlu1 %v525_v25, %s1127_s16  ;;  %s712_s16 = sshll.u32 %s708_s15, 4  ;;  %s713_s16 = int_to_ptr.hbm [resolvable:$true] %s712_s16 }
 0x452   : > { %v581_v26 = vpop.f32.mrf.mxu2 }
 0x453   : > { %v527_v27 = vpop.f32.mrf.mxu0 }
 0x454   : > { %646 = vrot.lane.b32.xlu1 %v581_v26, %s1128_s30  ;;  %s1042_s30 = sshra.s32 %s713_s16, 4  ;;  %s1043_s30 = int_to_ptr.hbm [resolvable:$true] %s1042_s30 }
 0x455   : > { %p1049_p5 = scmp.lt.s32.totalorder %s1043_s30, %s1360_s7 }
 0x45a   : > { %v583_v28 = vpop.f32.mrf.mxu2 }
 0x467   : > { %v637_v29 = vpop.f32.mrf.mxu0 }
 0x468   : > { %650 = vrot.lane.b32.xlu2 %v637_v29, %s1129_s8  ;;  %s1044_s8 = scalar_lea.hbm %s1043_s30, 8 }
 0x469   : > { %p1045_p1 = scmp.ne.s32.totalorder %s1043_s30, %s1044_s8  ;;  %p1050_p6 = scmp.lt.s32.totalorder %s1048_s17, %s1044_s8 }
 0x46b   : > { %p1046_p2 = pnand %p1045_p1, %p1210_p4  ;;  %p1051_p7 = por %p1050_p6, %p1049_p5 }
 0x46d   : > { %p1047_p3 = pneg %p1046_p2 }
 0x46f   : > { %v639_v30 = vpop.f32.mrf.mxu0  ;;  %p1052_p9 = pnand %p1051_p7, %p1047_p3 }
 0x4be   : > { %v643_v33 = vpop.permute.xlu1 %642 }
 0x4bf   : > { %v653_v34 = vsel %vm413_vm2, %v1294_v53, %v643_v33 }
 0x4c2   : > { %v651_v36 = vpop.permute.xlu2 %650 }
 0x4c6   : > { %v647_v35 = vpop.permute.xlu1 %646 }
 0x4c7   : > { %v655_v37 = vsel %vm654_vm4, %v653_v34, %v647_v35 }
 0x4c8   : > { %v657_v38 = vsel %vm656_vm5, %v655_v37, %v651_v36 }
 0x4c9   : > { %v658_v39 = vpack.c.bf16 %v657_v38, %v657_v38 }
 0x4cb   : > { %850 = vmatmul.msk.bf16.vlgmr.msra.gmra.mxu1 %vm348_vm0, %v658_v39 }
 0x548   : > { %v691_v41 = vpop.f32.mrf.mxu1 }
 0x549   : > { %v692_v42 = vadd.f32 %v951_v40, %v691_v41 }
 0x54b   : > { %695 = vst.msk [vmem:[%s317_s22] sm:$0xff] %vm348_vm0, %v692_v42 }
 0x54c   : > { %1055 = shalt.err (!%p1052_p9)
}
 0x54d   : > { %869 = dma.vmem_to_hbm [thread:$0]  (%p1210_p4), %s711_s23, 128, %s713_s16, %s697_s27  }
 0x550   : > { %v693_v43 = vpop.f32.mrf.mxu1 }
 0x551 PF: > { %p886_p10 = scmp.ge.s32.totalorder %s1114_s29, 2  ;;  %s724_s10 = sand.u32 1, %s1094_s24  }
 0x552   : > { %s725_s20 = scalar_lea.sflag [#allocation5], %s724_s10 }
 0x553   : > { %p879_p11 = pnand %p886_p10, %p1217_p8 }
 0x555   : > { %p880_p12 = pneg %p879_p11 }
 0x557   : > { %1089 = dma.done.wait (%p880_p12), %s725_s20, 128  }
 0x558   : > { %1091 = vsyncadd (%p880_p12), %s725_s20, 4294967168  ;;  %s22_s29 = sadd.s32 1, %s1114_s29   ;;  %s1365_s24 = smov %s1098_s25 }
 0x559   : > { %p19_p13 = scmp.ge.s32.totalorder %s22_s29, 4   ;;  %s1366_s25 = smov %s1102_s26 }
 0x55a   : > { %s1367_s26 = smov %s1223_s14  ;;  %s1368_s27 = smov %s1110_s28 }
 0x55b   : > { %s1369_s28 = smov %s1371_s9  ;;  %21 = sbr.rel (!%p19_p13) target bundleno = 6 (0x6), region = 97 }
 0x560   :  { %731 = vsyncpa [#allocation4], 1 }
 0x561   :  { %733 = vsyncpa [#allocation4 + $0x1], 1 }
 0x562   :  { %734 = vsyncpa [#allocation7], 1 }
 0x563   :  { %735 = vsyncpa [#allocation5], 1 }
 0x564   :  { %737 = vsyncpa [#allocation5 + $0x1], 1 }

</bundles_post_ra>
